<compile_context>
chip_gen: v5e
topology: v5e:2x2
jax: 0.10.0
libtpu: 0.0.40
codegen_flags: <defaults>
</compile_context>

<pallas_src>
import numpy as np
import jax
import jax.numpy as jnp
from jax import lax
from jax.experimental import pallas as pl
from jax.experimental.pallas import tpu as pltpu

SP_K = 4   # conv1 spatial kernel   (BasicR2Plus1D(chan, chan, chan, 4, 2, 3))
SP_S = 2   # conv1 spatial stride
SP_P = 3   # conv1 spatial padding
T_K = 3    # conv2 temporal kernel  (3,1,1)
T_P = 1    # conv2 temporal padding (1,0,0)

_LANES = 128


def _round_up(v, m):
    return -(-v // m) * m


# ---------------------------------------------------------------------------
# Fused Pallas kernel: the entire ResBlock for one batch sample.
# ---------------------------------------------------------------------------
def _resblock_kernel(x_ref, w1_ref, w2_ref, o_ref, tbuf):
    # x_ref : (1, T, D)        canonical activations, D = C_pad*H*W (128-multiple)
    # w1_ref: (NB, D, D)       folded spatial-conv matrix, one per block
    # w2_ref: (NB, KT, D, D)   folded temporal-conv matrix, one per block and tap
    # o_ref : (1, T, D)
    # tbuf  : VMEM (T + 2*T_P, D) scratch: zero-padded temporal window
    T, D = x_ref.shape[1], x_ref.shape[2]
    n_blocks = w1_ref.shape[0]
    kt_taps = w2_ref.shape[1]
    pad_t = (tbuf.shape[0] - T) // 2

    x0 = x_ref[0]                                           # (T, D)

    # Temporal halo rows stay zero for the whole kernel (never overwritten below).
    halo = jnp.zeros((pad_t, D), tbuf.dtype)
    tbuf[0:pad_t, :] = halo
    tbuf[T + pad_t:T + 2 * pad_t, :] = halo

    h = x0
    for b in range(n_blocks):
        # conv1 (1,k,k) spatial conv == one lane-dense MXU matmul, then ReLU.
        s = jnp.dot(h, w1_ref[b], preferred_element_type=jnp.float32)   # (T, D) f32
        s = jnp.maximum(s, 0.0)

        # conv2 (3,1,1) temporal conv == KT matmuls over t-shifted (T, D) slabs.
        tbuf[pad_t:pad_t + T, :] = s.astype(tbuf.dtype)
        acc = jnp.zeros((T, D), jnp.float32)
        for kt in range(kt_taps):
            acc = acc + jnp.dot(tbuf[kt:kt + T, :], w2_ref[b, kt],
                                preferred_element_type=jnp.float32)

        if b + 1 < n_blocks:
            h = jnp.maximum(acc, 0.0).astype(x0.dtype)      # Sequential ReLU
        else:
            # last block: NO ReLU before the residual -> exactly `net(x) + x`
            o_ref[0] = (acc + x0.astype(jnp.float32)).astype(o_ref.dtype)


# ---------------------------------------------------------------------------
# Host-side weight folding (plain JAX, executed once per call, tiny).
# ---------------------------------------------------------------------------
def _spatial_gather(H, W, Ho, Wo):
    """A[h, w, i, j, kh, kw] = 1 iff real input pixel (h, w) is the (kh, kw) tap of
    output pixel (i, j) of the stride-2 / k4 / pad-3 conv (zero padding implicit)."""
    A = np.zeros((H, W, Ho, Wo, SP_K, SP_K), np.float32)
    for i in range(Ho):
        for kh in range(SP_K):
            h = SP_S * i + kh - SP_P
            if not 0 <= h < H:
                continue
            for j in range(Wo):
                for kw in range(SP_K):
                    w = SP_S * j + kw - SP_P
                    if 0 <= w < W:
                        A[h, w, i, j, kh, kw] = 1.0
    return A


def _fold_spatial(w1_pt, A, H, W, Ho, Wo, D, dtype):
    # w1_pt: (Co, Ci, 1, KH, KW) PyTorch layout -> (Ci*H*W, Co*Ho*Wo), padded to (D, D)
    Co, Ci = w1_pt.shape[0], w1_pt.shape[1]
    m = jnp.einsum('oiyx,hwjkyx->ihwojk', w1_pt[:, :, 0], A)        # (Ci,H,W,Co,Ho,Wo)
    m = m.reshape(Ci * H * W, Co * Ho * Wo)
    m = jnp.pad(m, ((0, D - Ci * H * W), (0, D - Co * Ho * Wo)))
    return m.astype(dtype)


def _fold_temporal(w2_pt, HW, D, dtype):
    # w2_pt: (Co, Ci, KT, 1, 1) PyTorch layout -> per-tap kron(channel mix, I_HW),
    # i.e. (KT, Ci*HW, Co*HW), padded to (KT, D, D)
    Co, Ci, KT = w2_pt.shape[0], w2_pt.shape[1], w2_pt.shape[2]
    eye = np.eye(HW, dtype=np.float32)
    m = jnp.einsum('oik,pq->kipoq', w2_pt[:, :, :, 0, 0], eye)      # (KT,Ci,HW,Co,HW)
    m = m.reshape(KT, Ci * HW, Co * HW)
    m = jnp.pad(m, ((0, 0), (0, D - Ci * HW), (0, D - Co * HW)))
    return m.astype(dtype)


# ---------------------------------------------------------------------------
# Wrapper
# ---------------------------------------------------------------------------
def _resblock_forward(x, params_pt, compute_dtype=jnp.float32):
    """x: (N, C, T, H, W) NCDHW; params_pt: 3 tuples of PyTorch-layout conv weights."""
    N, C, T, H, W = x.shape
    Ho = (H + 2 * SP_P - SP_K) // SP_S + 1
    Wo = (W + 2 * SP_P - SP_K) // SP_S + 1
    # residual `net(x) + x` requires conv1 to preserve the spatial extent
    assert (Ho, Wo) == (H, W), "ResBlock residual requires H == W == 4 (or 3)"

    D = _round_up(C * H * W, _LANES)        # lane-dense, 128-aligned column axis
    A = _spatial_gather(H, W, Ho, Wo)
    w1m = jnp.stack([_fold_spatial(w1, A, H, W, Ho, Wo, D, compute_dtype)
                     for (w1, _) in params_pt])                     # (NB, D, D)
    w2m = jnp.stack([_fold_temporal(w2, H * W, D, compute_dtype)
                     for (_, w2) in params_pt])                     # (NB, KT, D, D)
    NB, KT = w1m.shape[0], w2m.shape[1]

    # Single layout pass in: NCDHW -> (N, T, C*H*W), zero-pad columns to D.
    xc = jnp.transpose(x, (0, 2, 1, 3, 4)).reshape(N, T, C * H * W)
    xc = jnp.pad(xc, ((0, 0), (0, 0), (0, D - C * H * W))).astype(compute_dtype)

    out = pl.pallas_call(
        _resblock_kernel,
        out_shape=jax.ShapeDtypeStruct((N, T, D), jnp.float32),
        grid=(N,),
        in_specs=[
            pl.BlockSpec((1, T, D), lambda n: (n, 0, 0)),
            pl.BlockSpec((NB, D, D), lambda n: (0, 0, 0)),
            pl.BlockSpec((NB, KT, D, D), lambda n: (0, 0, 0, 0)),
        ],
        out_specs=pl.BlockSpec((1, T, D), lambda n: (n, 0, 0)),
        scratch_shapes=[pltpu.VMEM((T + 2 * T_P, D), compute_dtype)],
        compiler_params=pltpu.CompilerParams(
            dimension_semantics=("parallel",),   # batch samples -> megacore on v7x
            vmem_limit_bytes=32 * 1024 * 1024,
        ),
    )(xc, w1m, w2m)

    # Single layout pass out: drop channel padding, back to NCDHW.
    out = out[:, :, :C * H * W].reshape(N, T, C, H, W)
    return jnp.transpose(out, (0, 2, 1, 3, 4))


resblock_pallas = jax.jit(_resblock_forward, static_argnames=("compute_dtype",))


# ---------------------------------------------------------------------------
# Pure-JAX reference (mirrors the PyTorch forward exactly, NCDHW, f32)
# ---------------------------------------------------------------------------
def resblock_reference(x, params_pt):
    dn = ('NCDHW', 'OIDHW', 'NCDHW')
    h = x
    for b, (w1, w2) in enumerate(params_pt):
        h = lax.conv_general_dilated(h, w1, window_strides=(1, SP_S, SP_S),
                                     padding=[(0, 0), (SP_P, SP_P), (SP_P, SP_P)],
                                     dimension_numbers=dn)
        h = jnp.maximum(h, 0.0)                      # ReLU inside BasicR2Plus1D
        h = lax.conv_general_dilated(h, w2, window_strides=(1, 1, 1),
                                     padding=[(T_P, T_P), (0, 0), (0, 0)],
                                     dimension_numbers=dn)
        if b < len(params_pt) - 1:
            h = jnp.maximum(h, 0.0)                  # Sequential ReLU between blocks
    return h + x


if __name__ == "__main__":
    # spatial 4 is the fixed point of the stride-2/k4/p3 conv -> residual shapes match
    N, C, T, H, W = 2, 4, 8, 4, 4
    key = jax.random.PRNGKey(0)
    ks = jax.random.split(key, 7)

    x = jax.random.normal(ks[0], (N, C, T, H, W), jnp.float32)
    params_pt = []
    for b in range(3):
        w1 = jax.random.normal(ks[1 + 2 * b], (C, C, 1, SP_K, SP_K), jnp.float32) * 0.2
        w2 = jax.random.normal(ks[2 + 2 * b], (C, C, T_K, 1, 1), jnp.float32) * 0.2
        params_pt.append((w1, w2))

    ref = resblock_reference(x, params_pt)

    # f32 compute path: matches the PyTorch module's f32 numerics (tight tolerance).
    out = jax.block_until_ready(resblock_pallas(x, params_pt))
    assert out.shape == x.shape
    np.testing.assert_allclose(np.asarray(out), np.asarray(ref), atol=1e-3, rtol=1e-3)

    # bf16 compute path (per perf review: halved footprint, native MXU dtype),
    # f32 accumulation; checked with a tolerance appropriate for bf16 inputs/weights.
    out_bf16 = jax.block_until_ready(
        resblock_pallas(x, params_pt, compute_dtype=jnp.bfloat16))
    np.testing.assert_allclose(np.asarray(out_bf16), np.asarray(ref),
                               atol=1e-1, rtol=1e-1)

    print("KERNEL_OK")
</pallas_src>

<mosaic_0001>
module attributes {stable_mosaic.version = 11 : i64} {
  func.func @_resblock_kernel(%arg0: i32, %arg1: memref<1x8x128xf32, #tpu.memory_space<vmem>>, %arg2: memref<3x128x128xf32, #tpu.memory_space<vmem>>, %arg3: memref<3x3x128x128xf32, #tpu.memory_space<vmem>>, %arg4: memref<1x8x128xf32, #tpu.memory_space<vmem>>, %arg5: memref<10x128xf32, #tpu.memory_space<vmem>>) attributes {dimension_semantics = [#tpu.dimension_semantics<parallel>], iteration_bounds = array<i64: 2>, scalar_prefetch = 0 : i64, scratch_operands = 1 : i64, tpu.core_type = #tpu.core_type<tc>, window_params = [{transform_indices = @transform_0, window_bounds = array<i64: 1, 8, 128>}, {pipeline_mode = #tpu.pipeline_mode<synchronous>, transform_indices = @transform_1, window_bounds = array<i64: 3, 128, 128>}, {pipeline_mode = #tpu.pipeline_mode<synchronous>, transform_indices = @transform_2, window_bounds = array<i64: 3, 3, 128, 128>}, {transform_indices = @transform_3, window_bounds = array<i64: 1, 8, 128>}]} {
    %c0 = arith.constant 0 : index
    %c0_0 = arith.constant 0 : index
    %c0_1 = arith.constant 0 : index
    %0 = vector.load %arg1[%c0, %c0_0, %c0_1] : memref<1x8x128xf32, #tpu.memory_space<vmem>>, vector<1x8x128xf32>
    %1 = vector.shape_cast %0 : vector<1x8x128xf32> to vector<8x128xf32>
    %cst = arith.constant 0.000000e+00 : f32
    %2 = vector.broadcast %cst : f32 to vector<1x128xf32>
    %c0_2 = arith.constant 0 : index
    %c0_3 = arith.constant 0 : index
    %3 = vector.load %arg5[%c0_2, %c0_3] : memref<10x128xf32, #tpu.memory_space<vmem>>, vector<1x128xf32>
    tpu.vector_store %arg5[%c0_2, %c0_3], %2 {strides = array<i32>} : memref<10x128xf32, #tpu.memory_space<vmem>>, vector<1x128xf32>,
    %c9 = arith.constant 9 : index
    %c0_4 = arith.constant 0 : index
    %4 = vector.load %arg5[%c9, %c0_4] : memref<10x128xf32, #tpu.memory_space<vmem>>, vector<1x128xf32>
    tpu.vector_store %arg5[%c9, %c0_4], %2 {strides = array<i32>} : memref<10x128xf32, #tpu.memory_space<vmem>>, vector<1x128xf32>,
    %c0_5 = arith.constant 0 : index
    %c0_6 = arith.constant 0 : index
    %c0_7 = arith.constant 0 : index
    %5 = vector.load %arg2[%c0_5, %c0_6, %c0_7] : memref<3x128x128xf32, #tpu.memory_space<vmem>>, vector<1x128x128xf32>
    %6 = vector.shape_cast %5 : vector<1x128x128xf32> to vector<128x128xf32>
    %cst_8 = arith.constant dense<0.000000e+00> : vector<8x128xf32>
    %7 = tpu.matmul %1, %6, %cst_8 {dimension_numbers = #tpu.dot_dimension_numbers<[1], [0], [0], [1], [0, 0, 1, 1], [], []>} : vector<8x128xf32>, vector<128x128xf32>, vector<8x128xf32> -> vector<8x128xf32>
    %cst_9 = arith.constant 0.000000e+00 : f32
    %8 = vector.broadcast %cst_9 : f32 to vector<8x128xf32>
    %9 = arith.maximumf %7, %8 : vector<8x128xf32>
    %c1 = arith.constant 1 : index
    %c0_10 = arith.constant 0 : index
    %10 = vector.load %arg5[%c1, %c0_10] : memref<10x128xf32, #tpu.memory_space<vmem>>, vector<8x128xf32>
    tpu.vector_store %arg5[%c1, %c0_10], %9 {strides = array<i32>} : memref<10x128xf32, #tpu.memory_space<vmem>>, vector<8x128xf32>,
    %cst_11 = arith.constant 0.000000e+00 : f32
    %11 = vector.broadcast %cst_11 : f32 to vector<8x128xf32>
    %c0_12 = arith.constant 0 : index
    %c0_13 = arith.constant 0 : index
    %12 = vector.load %arg5[%c0_12, %c0_13] : memref<10x128xf32, #tpu.memory_space<vmem>>, vector<8x128xf32>
    %c0_14 = arith.constant 0 : index
    %c0_15 = arith.constant 0 : index
    %c0_16 = arith.constant 0 : index
    %c0_17 = arith.constant 0 : index
    %13 = vector.load %arg3[%c0_14, %c0_15, %c0_16, %c0_17] : memref<3x3x128x128xf32, #tpu.memory_space<vmem>>, vector<1x1x128x128xf32>
    %14 = vector.shape_cast %13 : vector<1x1x128x128xf32> to vector<128x128xf32>
    %cst_18 = arith.constant dense<0.000000e+00> : vector<8x128xf32>
    %15 = tpu.matmul %12, %14, %cst_18 {dimension_numbers = #tpu.dot_dimension_numbers<[1], [0], [0], [1], [0, 0, 1, 1], [], []>} : vector<8x128xf32>, vector<128x128xf32>, vector<8x128xf32> -> vector<8x128xf32>
    %16 = arith.addf %11, %15 : vector<8x128xf32>
    %c1_19 = arith.constant 1 : index
    %c0_20 = arith.constant 0 : index
    %17 = vector.load %arg5[%c1_19, %c0_20] : memref<10x128xf32, #tpu.memory_space<vmem>>, vector<8x128xf32>
    %c0_21 = arith.constant 0 : index
    %c1_22 = arith.constant 1 : index
    %c0_23 = arith.constant 0 : index
    %c0_24 = arith.constant 0 : index
    %18 = vector.load %arg3[%c0_21, %c1_22, %c0_23, %c0_24] : memref<3x3x128x128xf32, #tpu.memory_space<vmem>>, vector<1x1x128x128xf32>
    %19 = vector.shape_cast %18 : vector<1x1x128x128xf32> to vector<128x128xf32>
    %cst_25 = arith.constant dense<0.000000e+00> : vector<8x128xf32>
    %20 = tpu.matmul %17, %19, %cst_25 {dimension_numbers = #tpu.dot_dimension_numbers<[1], [0], [0], [1], [0, 0, 1, 1], [], []>} : vector<8x128xf32>, vector<128x128xf32>, vector<8x128xf32> -> vector<8x128xf32>
    %21 = arith.addf %16, %20 : vector<8x128xf32>
    %c2 = arith.constant 2 : index
    %c0_26 = arith.constant 0 : index
    %22 = vector.load %arg5[%c2, %c0_26] : memref<10x128xf32, #tpu.memory_space<vmem>>, vector<8x128xf32>
    %c0_27 = arith.constant 0 : index
    %c2_28 = arith.constant 2 : index
    %c0_29 = arith.constant 0 : index
    %c0_30 = arith.constant 0 : index
    %23 = vector.load %arg3[%c0_27, %c2_28, %c0_29, %c0_30] : memref<3x3x128x128xf32, #tpu.memory_space<vmem>>, vector<1x1x128x128xf32>
    %24 = vector.shape_cast %23 : vector<1x1x128x128xf32> to vector<128x128xf32>
    %cst_31 = arith.constant dense<0.000000e+00> : vector<8x128xf32>
    %25 = tpu.matmul %22, %24, %cst_31 {dimension_numbers = #tpu.dot_dimension_numbers<[1], [0], [0], [1], [0, 0, 1, 1], [], []>} : vector<8x128xf32>, vector<128x128xf32>, vector<8x128xf32> -> vector<8x128xf32>
    %26 = arith.addf %21, %25 : vector<8x128xf32>
    %cst_32 = arith.constant 0.000000e+00 : f32
    %27 = vector.broadcast %cst_32 : f32 to vector<8x128xf32>
    %28 = arith.maximumf %26, %27 : vector<8x128xf32>
    %c1_33 = arith.constant 1 : index
    %c0_34 = arith.constant 0 : index
    %c0_35 = arith.constant 0 : index
    %29 = vector.load %arg2[%c1_33, %c0_34, %c0_35] : memref<3x128x128xf32, #tpu.memory_space<vmem>>, vector<1x128x128xf32>
    %30 = vector.shape_cast %29 : vector<1x128x128xf32> to vector<128x128xf32>
    %cst_36 = arith.constant dense<0.000000e+00> : vector<8x128xf32>
    %31 = tpu.matmul %28, %30, %cst_36 {dimension_numbers = #tpu.dot_dimension_numbers<[1], [0], [0], [1], [0, 0, 1, 1], [], []>} : vector<8x128xf32>, vector<128x128xf32>, vector<8x128xf32> -> vector<8x128xf32>
    %cst_37 = arith.constant 0.000000e+00 : f32
    %32 = vector.broadcast %cst_37 : f32 to vector<8x128xf32>
    %33 = arith.maximumf %31, %32 : vector<8x128xf32>
    %c1_38 = arith.constant 1 : index
    %c0_39 = arith.constant 0 : index
    %34 = vector.load %arg5[%c1_38, %c0_39] : memref<10x128xf32, #tpu.memory_space<vmem>>, vector<8x128xf32>
    tpu.vector_store %arg5[%c1_38, %c0_39], %33 {strides = array<i32>} : memref<10x128xf32, #tpu.memory_space<vmem>>, vector<8x128xf32>,
    %cst_40 = arith.constant 0.000000e+00 : f32
    %35 = vector.broadcast %cst_40 : f32 to vector<8x128xf32>
    %c0_41 = arith.constant 0 : index
    %c0_42 = arith.constant 0 : index
    %36 = vector.load %arg5[%c0_41, %c0_42] : memref<10x128xf32, #tpu.memory_space<vmem>>, vector<8x128xf32>
    %c1_43 = arith.constant 1 : index
    %c0_44 = arith.constant 0 : index
    %c0_45 = arith.constant 0 : index
    %c0_46 = arith.constant 0 : index
    %37 = vector.load %arg3[%c1_43, %c0_44, %c0_45, %c0_46] : memref<3x3x128x128xf32, #tpu.memory_space<vmem>>, vector<1x1x128x128xf32>
    %38 = vector.shape_cast %37 : vector<1x1x128x128xf32> to vector<128x128xf32>
    %cst_47 = arith.constant dense<0.000000e+00> : vector<8x128xf32>
    %39 = tpu.matmul %36, %38, %cst_47 {dimension_numbers = #tpu.dot_dimension_numbers<[1], [0], [0], [1], [0, 0, 1, 1], [], []>} : vector<8x128xf32>, vector<128x128xf32>, vector<8x128xf32> -> vector<8x128xf32>
    %40 = arith.addf %35, %39 : vector<8x128xf32>
    %c1_48 = arith.constant 1 : index
    %c0_49 = arith.constant 0 : index
    %41 = vector.load %arg5[%c1_48, %c0_49] : memref<10x128xf32, #tpu.memory_space<vmem>>, vector<8x128xf32>
    %c1_50 = arith.constant 1 : index
    %c1_51 = arith.constant 1 : index
    %c0_52 = arith.constant 0 : index
    %c0_53 = arith.constant 0 : index
    %42 = vector.load %arg3[%c1_50, %c1_51, %c0_52, %c0_53] : memref<3x3x128x128xf32, #tpu.memory_space<vmem>>, vector<1x1x128x128xf32>
    %43 = vector.shape_cast %42 : vector<1x1x128x128xf32> to vector<128x128xf32>
    %cst_54 = arith.constant dense<0.000000e+00> : vector<8x128xf32>
    %44 = tpu.matmul %41, %43, %cst_54 {dimension_numbers = #tpu.dot_dimension_numbers<[1], [0], [0], [1], [0, 0, 1, 1], [], []>} : vector<8x128xf32>, vector<128x128xf32>, vector<8x128xf32> -> vector<8x128xf32>
    %45 = arith.addf %40, %44 : vector<8x128xf32>
    %c2_55 = arith.constant 2 : index
    %c0_56 = arith.constant 0 : index
    %46 = vector.load %arg5[%c2_55, %c0_56] : memref<10x128xf32, #tpu.memory_space<vmem>>, vector<8x128xf32>
    %c1_57 = arith.constant 1 : index
    %c2_58 = arith.constant 2 : index
    %c0_59 = arith.constant 0 : index
    %c0_60 = arith.constant 0 : index
    %47 = vector.load %arg3[%c1_57, %c2_58, %c0_59, %c0_60] : memref<3x3x128x128xf32, #tpu.memory_space<vmem>>, vector<1x1x128x128xf32>
    %48 = vector.shape_cast %47 : vector<1x1x128x128xf32> to vector<128x128xf32>
    %cst_61 = arith.constant dense<0.000000e+00> : vector<8x128xf32>
    %49 = tpu.matmul %46, %48, %cst_61 {dimension_numbers = #tpu.dot_dimension_numbers<[1], [0], [0], [1], [0, 0, 1, 1], [], []>} : vector<8x128xf32>, vector<128x128xf32>, vector<8x128xf32> -> vector<8x128xf32>
    %50 = arith.addf %45, %49 : vector<8x128xf32>
    %cst_62 = arith.constant 0.000000e+00 : f32
    %51 = vector.broadcast %cst_62 : f32 to vector<8x128xf32>
    %52 = arith.maximumf %50, %51 : vector<8x128xf32>
    %c2_63 = arith.constant 2 : index
    %c0_64 = arith.constant 0 : index
    %c0_65 = arith.constant 0 : index
    %53 = vector.load %arg2[%c2_63, %c0_64, %c0_65] : memref<3x128x128xf32, #tpu.memory_space<vmem>>, vector<1x128x128xf32>
    %54 = vector.shape_cast %53 : vector<1x128x128xf32> to vector<128x128xf32>
    %cst_66 = arith.constant dense<0.000000e+00> : vector<8x128xf32>
    %55 = tpu.matmul %52, %54, %cst_66 {dimension_numbers = #tpu.dot_dimension_numbers<[1], [0], [0], [1], [0, 0, 1, 1], [], []>} : vector<8x128xf32>, vector<128x128xf32>, vector<8x128xf32> -> vector<8x128xf32>
    %cst_67 = arith.constant 0.000000e+00 : f32
    %56 = vector.broadcast %cst_67 : f32 to vector<8x128xf32>
    %57 = arith.maximumf %55, %56 : vector<8x128xf32>
    %c1_68 = arith.constant 1 : index
    %c0_69 = arith.constant 0 : index
    %58 = vector.load %arg5[%c1_68, %c0_69] : memref<10x128xf32, #tpu.memory_space<vmem>>, vector<8x128xf32>
    tpu.vector_store %arg5[%c1_68, %c0_69], %57 {strides = array<i32>} : memref<10x128xf32, #tpu.memory_space<vmem>>, vector<8x128xf32>,
    %cst_70 = arith.constant 0.000000e+00 : f32
    %59 = vector.broadcast %cst_70 : f32 to vector<8x128xf32>
    %c0_71 = arith.constant 0 : index
    %c0_72 = arith.constant 0 : index
    %60 = vector.load %arg5[%c0_71, %c0_72] : memref<10x128xf32, #tpu.memory_space<vmem>>, vector<8x128xf32>
    %c2_73 = arith.constant 2 : index
    %c0_74 = arith.constant 0 : index
    %c0_75 = arith.constant 0 : index
    %c0_76 = arith.constant 0 : index
    %61 = vector.load %arg3[%c2_73, %c0_74, %c0_75, %c0_76] : memref<3x3x128x128xf32, #tpu.memory_space<vmem>>, vector<1x1x128x128xf32>
    %62 = vector.shape_cast %61 : vector<1x1x128x128xf32> to vector<128x128xf32>
    %cst_77 = arith.constant dense<0.000000e+00> : vector<8x128xf32>
    %63 = tpu.matmul %60, %62, %cst_77 {dimension_numbers = #tpu.dot_dimension_numbers<[1], [0], [0], [1], [0, 0, 1, 1], [], []>} : vector<8x128xf32>, vector<128x128xf32>, vector<8x128xf32> -> vector<8x128xf32>
    %64 = arith.addf %59, %63 : vector<8x128xf32>
    %c1_78 = arith.constant 1 : index
    %c0_79 = arith.constant 0 : index
    %65 = vector.load %arg5[%c1_78, %c0_79] : memref<10x128xf32, #tpu.memory_space<vmem>>, vector<8x128xf32>
    %c2_80 = arith.constant 2 : index
    %c1_81 = arith.constant 1 : index
    %c0_82 = arith.constant 0 : index
    %c0_83 = arith.constant 0 : index
    %66 = vector.load %arg3[%c2_80, %c1_81, %c0_82, %c0_83] : memref<3x3x128x128xf32, #tpu.memory_space<vmem>>, vector<1x1x128x128xf32>
    %67 = vector.shape_cast %66 : vector<1x1x128x128xf32> to vector<128x128xf32>
    %cst_84 = arith.constant dense<0.000000e+00> : vector<8x128xf32>
    %68 = tpu.matmul %65, %67, %cst_84 {dimension_numbers = #tpu.dot_dimension_numbers<[1], [0], [0], [1], [0, 0, 1, 1], [], []>} : vector<8x128xf32>, vector<128x128xf32>, vector<8x128xf32> -> vector<8x128xf32>
    %69 = arith.addf %64, %68 : vector<8x128xf32>
    %c2_85 = arith.constant 2 : index
    %c0_86 = arith.constant 0 : index
    %70 = vector.load %arg5[%c2_85, %c0_86] : memref<10x128xf32, #tpu.memory_space<vmem>>, vector<8x128xf32>
    %c2_87 = arith.constant 2 : index
    %c2_88 = arith.constant 2 : index
    %c0_89 = arith.constant 0 : index
    %c0_90 = arith.constant 0 : index
    %71 = vector.load %arg3[%c2_87, %c2_88, %c0_89, %c0_90] : memref<3x3x128x128xf32, #tpu.memory_space<vmem>>, vector<1x1x128x128xf32>
    %72 = vector.shape_cast %71 : vector<1x1x128x128xf32> to vector<128x128xf32>
    %cst_91 = arith.constant dense<0.000000e+00> : vector<8x128xf32>
    %73 = tpu.matmul %70, %72, %cst_91 {dimension_numbers = #tpu.dot_dimension_numbers<[1], [0], [0], [1], [0, 0, 1, 1], [], []>} : vector<8x128xf32>, vector<128x128xf32>, vector<8x128xf32> -> vector<8x128xf32>
    %74 = arith.addf %69, %73 : vector<8x128xf32>
    %75 = arith.addf %74, %1 : vector<8x128xf32>
    %c0_92 = arith.constant 0 : index
    %c0_93 = arith.constant 0 : index
    %c0_94 = arith.constant 0 : index
    %76 = vector.load %arg4[%c0_92, %c0_93, %c0_94] : memref<1x8x128xf32, #tpu.memory_space<vmem>>, vector<1x8x128xf32>
    %77 = vector.shape_cast %76 : vector<1x8x128xf32> to vector<8x128xf32>
    %78 = vector.shape_cast %75 : vector<8x128xf32> to vector<1x8x128xf32>
    tpu.vector_store %arg4[%c0_92, %c0_93, %c0_94], %78 {strides = array<i32>} : memref<1x8x128xf32, #tpu.memory_space<vmem>>, vector<1x8x128xf32>,
    return
  }
  func.func @transform_0(%arg0: i32) -> (i32, i32, i32) {
    %c0_i32 = arith.constant 0 : i32
    %c0_i32_0 = arith.constant 0 : i32
    %c0_i32_1 = arith.constant 0 : i32
    return %arg0, %c0_i32, %c0_i32_0 : i32, i32, i32
  }
  func.func @transform_1(%arg0: i32) -> (i32, i32, i32) {
    %c0_i32 = arith.constant 0 : i32
    %c0_i32_0 = arith.constant 0 : i32
    %c0_i32_1 = arith.constant 0 : i32
    %c0_i32_2 = arith.constant 0 : i32
    return %c0_i32, %c0_i32_0, %c0_i32_1 : i32, i32, i32
  }
  func.func @transform_2(%arg0: i32) -> (i32, i32, i32, i32) {
    %c0_i32 = arith.constant 0 : i32
    %c0_i32_0 = arith.constant 0 : i32
    %c0_i32_1 = arith.constant 0 : i32
    %c0_i32_2 = arith.constant 0 : i32
    %c0_i32_3 = arith.constant 0 : i32
    return %c0_i32, %c0_i32_0, %c0_i32_1, %c0_i32_2 : i32, i32, i32, i32
  }
  func.func @transform_3(%arg0: i32) -> (i32, i32, i32) {
    %c0_i32 = arith.constant 0 : i32
    %c0_i32_0 = arith.constant 0 : i32
    %c0_i32_1 = arith.constant 0 : i32
    return %arg0, %c0_i32, %c0_i32_0 : i32, i32, i32
  }
}

</mosaic_0001>

<bundles_post_ra>
// kernel: _resblock_forward.1
= control target key start
LH: loop header
LB: loop body
LE: loop exit
PB: predicated region body
PF: predicated region fallthrough
CT: control target
= control target key end

     0   :  { %s893_s12 = smov 0   ;;  %s1507_s0 = inlined_call_operand.vmem [shape: f32[2,8,128], index: 0, kind: input, shape index: {}]   ;;  %s1508_s1 = inlined_call_operand.vmem [shape: f32[3,128,128], index: 1, kind: input, shape index: {}]   ;;  %s1509_s2 = inlined_call_operand.vmem [shape: f32[3,3,128,128], index: 2, kind: input, shape index: {}]   ;;  %s1510_s3 = inlined_call_operand.vmem [shape: f32[2,8,128], index: 3, kind: output, shape index: {}]  }
   0x1 LB: > { %s686_s13 = sadd.s32 4294967295, %s870_s12   ;;  %p690_p0 = scmp.ge.s32.totalorder %s870_s12, 1  ;;  %s870_s12 = sphi %s893_s12, %s13_s12  }
   0x2   : > { %p136_p1 = scmp.lt.s32.totalorder %s870_s12, 3 }
   0x4   : > { %p137_p2 = pnand %p690_p0, %p136_p1 }
   0x5   : > { %p984_p3 = scmp.lt.s32.totalorder (!%p137_p2), %s686_s13, 1 }
   0x6   : > { %140 = sbr.rel (%p137_p2) target bundleno = 866 (0x362), region = 32 }
   0xb   : > { %v184_v0 = vld [vmem:[%s1508_s1 + $0x78] sm:$0xff]  ;;  %v183_v1 = vld [vmem:[%s1508_s1 + $0x70] sm:$0xff]  ;;  %v182_v2 = vld [vmem:[%s1508_s1 + $0x68] sm:$0xff]  ;;  %s1513_s13 = smov (!%p984_p3, %s686_s13), 1  ;;  %v872_v60 = vmov 0.0  }
   0xc   : > { %185 = vmatpush.msra.mxu0 %v184_v0  ;;  %v181_v3 = vld [vmem:[%s1508_s1 + $0x60] sm:$0xff]  ;;  %v708_v4 = vld [vmem:[%s1509_s2 + $0xf8] sm:$0xff]  ;;  %v707_v8 = vld [vmem:[%s1509_s2 + $0xf0] sm:$0xff]  ;;  %s691_s26 = sshll.u32 %s1513_s13, 3  ;;  %167 = vst [vmem:[#allocation2] sm:$0x1] %v872_v60 }
   0xd   : > { %v223_v5 = vld [vmem:[%s1509_s2 + $0x78] sm:$0xff]  ;;  %242 = vmatpush.msra.mxu1 %v708_v4  ;;  %v222_v9 = vld [vmem:[%s1509_s2 + $0x70] sm:$0xff]  ;;  %v706_v11 = vld [vmem:[%s1509_s2 + $0xe8] sm:$0xff]  ;;  %s161_s6 = scalar_lea.vmem %s1507_s0, %s691_s26  ;;  %168 = vst [vmem:[#allocation2 + $0x9] sm:$0x1] %v872_v60  ;;  %s165_s17 = scalar_lea.vmem %s1510_s3, %s691_s26 }
   0xe   : > { %186 = vmatpush.msra.mxu0 %v183_v1  ;;  %v180_v6 = vld [vmem:[%s1508_s1 + $0x58] sm:$0xff]  ;;  %262 = vmatpush.msra.mxu2 %v223_v5  ;;  %v723_v10 = vld [vmem:[%s1509_s2 + $0x170] sm:$0xff]  ;;  %v221_v13 = vld [vmem:[%s1509_s2 + $0x68] sm:$0xff] }
   0xf   : > { %v724_v7 = vld [vmem:[%s1509_s2 + $0x178] sm:$0xff]  ;;  %v179_v12 = vld [vmem:[%s1508_s1 + $0x50] sm:$0xff]  ;;  %243 = vmatpush.msra.mxu1 %v707_v8  ;;  %v722_v14 = vld [vmem:[%s1509_s2 + $0x168] sm:$0xff] }
  0x10   : > { %187 = vmatpush.msra.mxu0 %v182_v2  ;;  %300 = vmatpush.msra.mxu3 %v724_v7  ;;  %v705_v15 = vld [vmem:[%s1509_s2 + $0xe0] sm:$0xff]  ;;  %v178_v17 = vld [vmem:[%s1508_s1 + $0x48] sm:$0xff]  ;;  %v704_v19 = vld [vmem:[%s1509_s2 + $0xd8] sm:$0xff] }
  0x11   : > { %263 = vmatpush.msra.mxu2 %v222_v9  ;;  %v220_v16 = vld [vmem:[%s1509_s2 + $0x60] sm:$0xff]  ;;  %244 = vmatpush.msra.mxu1 %v706_v11  ;;  %v219_v20 = vld [vmem:[%s1509_s2 + $0x58] sm:$0xff]  ;;  %v703_v23 = vld [vmem:[%s1509_s2 + $0xd0] sm:$0xff] }
  0x12   : > { %188 = vmatpush.msra.mxu0 %v181_v3  ;;  %301 = vmatpush.msra.mxu3 %v723_v10  ;;  %v721_v18 = vld [vmem:[%s1509_s2 + $0x160] sm:$0xff]  ;;  %v720_v22 = vld [vmem:[%s1509_s2 + $0x158] sm:$0xff]  ;;  %v218_v24 = vld [vmem:[%s1509_s2 + $0x50] sm:$0xff] }
  0x13   : > { %264 = vmatpush.msra.mxu2 %v221_v13  ;;  %v177_v21 = vld [vmem:[%s1508_s1 + $0x40] sm:$0xff]  ;;  %245 = vmatpush.msra.mxu1 %v705_v15  ;;  %v176_v25 = vld [vmem:[%s1508_s1 + $0x38] sm:$0xff]  ;;  %v719_v26 = vld [vmem:[%s1509_s2 + $0x150] sm:$0xff] }
  0x14   : > { %189 = vmatpush.msra.mxu0 %v180_v6  ;;  %302 = vmatpush.msra.mxu3 %v722_v14  ;;  %v702_v27 = vld [vmem:[%s1509_s2 + $0xc8] sm:$0xff]  ;;  %v175_v29 = vld [vmem:[%s1508_s1 + $0x30] sm:$0xff]  ;;  %v701_v31 = vld [vmem:[%s1509_s2 + $0xc0] sm:$0xff] }
  0x15   : > { %265 = vmatpush.msra.mxu2 %v220_v16  ;;  %246 = vmatpush.msra.mxu1 %v704_v19  ;;  %v217_v28 = vld [vmem:[%s1509_s2 + $0x48] sm:$0xff]  ;;  %v216_v32 = vld [vmem:[%s1509_s2 + $0x40] sm:$0xff]  ;;  %v700_v35 = vld [vmem:[%s1509_s2 + $0xb8] sm:$0xff] }
  0x16   : > { %190 = vmatpush.msra.mxu0 %v179_v12  ;;  %303 = vmatpush.msra.mxu3 %v721_v18  ;;  %v718_v30 = vld [vmem:[%s1509_s2 + $0x148] sm:$0xff]  ;;  %v717_v34 = vld [vmem:[%s1509_s2 + $0x140] sm:$0xff]  ;;  %v215_v36 = vld [vmem:[%s1509_s2 + $0x38] sm:$0xff] }
  0x17   : > { %266 = vmatpush.msra.mxu2 %v219_v20  ;;  %247 = vmatpush.msra.mxu1 %v703_v23  ;;  %v174_v33 = vld [vmem:[%s1508_s1 + $0x28] sm:$0xff]  ;;  %v173_v37 = vld [vmem:[%s1508_s1 + $0x20] sm:$0xff]  ;;  %v716_v38 = vld [vmem:[%s1509_s2 + $0x138] sm:$0xff] }
  0x18   : > { %191 = vmatpush.msra.mxu0 %v178_v17  ;;  %304 = vmatpush.msra.mxu3 %v720_v22  ;;  %v699_v39 = vld [vmem:[%s1509_s2 + $0xb0] sm:$0xff]  ;;  %v172_v41 = vld [vmem:[%s1508_s1 + $0x18] sm:$0xff]  ;;  %v170_v44 = vld [vmem:[%s1508_s1 + $0x8] sm:$0xff] }
  0x19   : > { %267 = vmatpush.msra.mxu2 %v218_v24  ;;  %248 = vmatpush.msra.mxu1 %v702_v27  ;;  %v214_v40 = vld [vmem:[%s1509_s2 + $0x30] sm:$0xff]  ;;  %v169_v45 = vld [vmem:[%s1508_s1] sm:$0xff]  ;;  %v698_v47 = vld [vmem:[%s1509_s2 + $0xa8] sm:$0xff] }
  0x1a   : > { %192 = vmatpush.msra.mxu0 %v177_v21  ;;  %305 = vmatpush.msra.mxu3 %v719_v26  ;;  %v715_v42 = vld [vmem:[%s1509_s2 + $0x130] sm:$0xff]  ;;  %v1057_v46 = vld [vmem:[%s161_s6] sm:$0xff]  ;;  %v696_v49 = vld [vmem:[%s1509_s2 + $0x98] sm:$0xff] }
  0x1b   : > { %268 = vmatpush.msra.mxu2 %v217_v28  ;;  %249 = vmatpush.msra.mxu1 %v701_v31  ;;  %v171_v43 = vld [vmem:[%s1508_s1 + $0x10] sm:$0xff]  ;;  %v697_v48 = vld [vmem:[%s1509_s2 + $0xa0] sm:$0xff]  ;;  %v213_v51 = vld [vmem:[%s1509_s2 + $0x28] sm:$0xff] }
  0x1c   : > { %193 = vmatpush.msra.mxu0 %v176_v25  ;;  %306 = vmatpush.msra.mxu3 %v718_v30  ;;  %v695_v50 = vld [vmem:[%s1509_s2 + $0x90] sm:$0xff]  ;;  %v714_v52 = vld [vmem:[%s1509_s2 + $0x128] sm:$0xff]  ;;  %v212_v54 = vld [vmem:[%s1509_s2 + $0x20] sm:$0xff] }
  0x1d   : > { %269 = vmatpush.msra.mxu2 %v216_v32  ;;  %250 = vmatpush.msra.mxu1 %v700_v35  ;;  %v694_v53 = vld [vmem:[%s1509_s2 + $0x88] sm:$0xff]  ;;  %v713_v55 = vld [vmem:[%s1509_s2 + $0x120] sm:$0xff]  ;;  %v211_v57 = vld [vmem:[%s1509_s2 + $0x18] sm:$0xff] }
  0x1e   : > { %194 = vmatpush.msra.mxu0 %v175_v29  ;;  %307 = vmatpush.msra.mxu3 %v717_v34  ;;  %v693_v56 = vld [vmem:[%s1509_s2 + $0x80] sm:$0xff]  ;;  %v712_v58 = vld [vmem:[%s1509_s2 + $0x118] sm:$0xff]  ;;  %v210_v59 = vld [vmem:[%s1509_s2 + $0x10] sm:$0xff] }
  0x1f   : > { %270 = vmatpush.msra.mxu2 %v215_v36  ;;  %251 = vmatpush.msra.mxu1 %v699_v39  ;;  %v711_v61 = vld [vmem:[%s1509_s2 + $0x110] sm:$0xff]  ;;  %v209_v62 = vld [vmem:[%s1509_s2 + $0x8] sm:$0xff]  ;;  %v208_v0 = vld [vmem:[%s1509_s2] sm:$0xff] }
  0x20   : > { %195 = vmatpush.msra.mxu0 %v174_v33  ;;  %308 = vmatpush.msra.mxu3 %v716_v38  ;;  %v710_v63 = vld [vmem:[%s1509_s2 + $0x108] sm:$0xff]  ;;  %v709_v1 = vld [vmem:[%s1509_s2 + $0x100] sm:$0xff]  ;;  %v740_v2 = vld [vmem:[%s1508_s1 + $0xf8] sm:$0xff] }
  0x21   : > { %271 = vmatpush.msra.mxu2 %v214_v40  ;;  %252 = vmatpush.msra.mxu1 %v698_v47  ;;  %v739_v3 = vld [vmem:[%s1508_s1 + $0xf0] sm:$0xff]  ;;  %v738_v4 = vld [vmem:[%s1508_s1 + $0xe8] sm:$0xff]  ;;  %v737_v5 = vld [vmem:[%s1508_s1 + $0xe0] sm:$0xff] }
  0x22   : > { %196 = vmatpush.msra.mxu0 %v173_v37  ;;  %309 = vmatpush.msra.mxu3 %v715_v42  ;;  %v736_v6 = vld [vmem:[%s1508_s1 + $0xd8] sm:$0xff]  ;;  %v735_v7 = vld [vmem:[%s1508_s1 + $0xd0] sm:$0xff]  ;;  %v734_v8 = vld [vmem:[%s1508_s1 + $0xc8] sm:$0xff] }
  0x23   : > { %253 = vmatpush.msra.mxu1 %v697_v48  ;;  %272 = vmatpush.msra.mxu2 %v213_v51  ;;  %v733_v9 = vld [vmem:[%s1508_s1 + $0xc0] sm:$0xff]  ;;  %v732_v10 = vld [vmem:[%s1508_s1 + $0xb8] sm:$0xff]  ;;  %v731_v15 = vld [vmem:[%s1508_s1 + $0xb0] sm:$0xff] }
  0x24   : > { %197 = vmatpush.msra.mxu0 %v172_v41  ;;  %310 = vmatpush.msra.mxu3 %v714_v52  ;;  %v730_v16 = vld [vmem:[%s1508_s1 + $0xa8] sm:$0xff]  ;;  %v729_v17 = vld [vmem:[%s1508_s1 + $0xa0] sm:$0xff]  ;;  %v728_v18 = vld [vmem:[%s1508_s1 + $0x98] sm:$0xff] }
  0x25   : > { %254 = vmatpush.msra.mxu1 %v696_v49  ;;  %273 = vmatpush.msra.mxu2 %v212_v54  ;;  %v727_v19 = vld [vmem:[%s1508_s1 + $0x90] sm:$0xff]  ;;  %v726_v20 = vld [vmem:[%s1508_s1 + $0x88] sm:$0xff]  ;;  %v725_v21 = vld [vmem:[%s1508_s1 + $0x80] sm:$0xff] }
  0x26   : > { %198 = vmatpush.msra.mxu0 %v171_v43  ;;  %311 = vmatpush.msra.mxu3 %v713_v55  ;;  %v772_v22 = vld [vmem:[%s1509_s2 + $0x278] sm:$0xff]  ;;  %v771_v25 = vld [vmem:[%s1509_s2 + $0x270] sm:$0xff]  ;;  %v770_v28 = vld [vmem:[%s1509_s2 + $0x268] sm:$0xff] }
  0x27   : > { %255 = vmatpush.msra.mxu1 %v695_v50  ;;  %274 = vmatpush.msra.mxu2 %v211_v57  ;;  %v756_v23 = vld [vmem:[%s1509_s2 + $0x1f8] sm:$0xff]  ;;  %v755_v26 = vld [vmem:[%s1509_s2 + $0x1f0] sm:$0xff]  ;;  %v754_v29 = vld [vmem:[%s1509_s2 + $0x1e8] sm:$0xff] }
  0x28   : > { %199 = vmatpush.msra.mxu0 %v170_v44  ;;  %312 = vmatpush.msra.mxu3 %v712_v58  ;;  %v788_v24 = vld [vmem:[%s1509_s2 + $0x2f8] sm:$0xff]  ;;  %v787_v27 = vld [vmem:[%s1509_s2 + $0x2f0] sm:$0xff]  ;;  %v786_v30 = vld [vmem:[%s1509_s2 + $0x2e8] sm:$0xff] }
  0x29   : > { %256 = vmatpush.msra.mxu1 %v694_v53  ;;  %275 = vmatpush.msra.mxu2 %v210_v59  ;;  %v769_v31 = vld [vmem:[%s1509_s2 + $0x260] sm:$0xff]  ;;  %v768_v34 = vld [vmem:[%s1509_s2 + $0x258] sm:$0xff]  ;;  %v767_v37 = vld [vmem:[%s1509_s2 + $0x250] sm:$0xff] }
  0x2a   : > { %200 = vmatpush.msra.mxu0 %v169_v45  ;;  %313 = vmatpush.msra.mxu3 %v711_v61  ;;  %v753_v32 = vld [vmem:[%s1509_s2 + $0x1e0] sm:$0xff]  ;;  %v752_v35 = vld [vmem:[%s1509_s2 + $0x1d8] sm:$0xff]  ;;  %v751_v38 = vld [vmem:[%s1509_s2 + $0x1d0] sm:$0xff] }
  0x2b   : > { %201 = vmatmul.f32.vlgmr.msra.gmra.mxu0 %v1057_v46  ;;  %257 = vmatpush.msra.mxu1 %v693_v56  ;;  %v785_v33 = vld [vmem:[%s1509_s2 + $0x2e0] sm:$0xff]  ;;  %v784_v36 = vld [vmem:[%s1509_s2 + $0x2d8] sm:$0xff]  ;;  %v783_v39 = vld [vmem:[%s1509_s2 + $0x2d0] sm:$0xff] }
  0x2c   : > { %276 = vmatpush.msra.mxu2 %v209_v62  ;;  %314 = vmatpush.msra.mxu3 %v710_v63  ;;  %v766_v40 = vld [vmem:[%s1509_s2 + $0x248] sm:$0xff]  ;;  %v765_v43 = vld [vmem:[%s1509_s2 + $0x240] sm:$0xff]  ;;  %v764_v47 = vld [vmem:[%s1509_s2 + $0x238] sm:$0xff] }
  0x2d   : > { %339 = vmatpush.msrb.mxu0 %v740_v2  ;;  %397 = vmatpush.msrb.mxu1 %v772_v22  ;;  %v750_v41 = vld [vmem:[%s1509_s2 + $0x1c8] sm:$0xff]  ;;  %v749_v44 = vld [vmem:[%s1509_s2 + $0x1c0] sm:$0xff]  ;;  %v748_v48 = vld [vmem:[%s1509_s2 + $0x1b8] sm:$0xff] }
  0x2e   : > { %277 = vmatpush.msra.mxu2 %v208_v0  ;;  %315 = vmatpush.msra.mxu3 %v709_v1  ;;  %v782_v42 = vld [vmem:[%s1509_s2 + $0x2c8] sm:$0xff]  ;;  %v781_v45 = vld [vmem:[%s1509_s2 + $0x2c0] sm:$0xff]  ;;  %v780_v49 = vld [vmem:[%s1509_s2 + $0x2b8] sm:$0xff] }
  0x2f   : > { %340 = vmatpush.msrb.mxu0 %v739_v3  ;;  %398 = vmatpush.msrb.mxu1 %v771_v25  ;;  %v763_v50 = vld [vmem:[%s1509_s2 + $0x230] sm:$0xff]  ;;  %v762_v59 = vld [vmem:[%s1509_s2 + $0x228] sm:$0xff]  ;;  %v761_v60 = vld [vmem:[%s1509_s2 + $0x220] sm:$0xff] }
  0x30   : > { %417 = vmatpush.msrb.mxu2 %v756_v23  ;;  %455 = vmatpush.msrb.mxu3 %v788_v24  ;;  %v747_v51 = vld [vmem:[%s1509_s2 + $0x1b0] sm:$0xff]  ;;  %v760_v61 = vld [vmem:[%s1509_s2 + $0x218] sm:$0xff]  ;;  %v746_v63 = vld [vmem:[%s1509_s2 + $0x1a8] sm:$0xff] }
  0x31   : > { %341 = vmatpush.msrb.mxu0 %v738_v4  ;;  %399 = vmatpush.msrb.mxu1 %v770_v28  ;;  %v779_v52 = vld [vmem:[%s1509_s2 + $0x2b0] sm:$0xff]  ;;  %v778_v0 = vld [vmem:[%s1509_s2 + $0x2a8] sm:$0xff]  ;;  %v745_v2 = vld [vmem:[%s1509_s2 + $0x1a0] sm:$0xff] }
  0x32   : > { %418 = vmatpush.msrb.mxu2 %v755_v26  ;;  %456 = vmatpush.msrb.mxu3 %v787_v27  ;;  %v759_v62 = vld [vmem:[%s1509_s2 + $0x210] sm:$0xff]  ;;  %v758_v1 = vld [vmem:[%s1509_s2 + $0x208] sm:$0xff]  ;;  %v777_v3 = vld [vmem:[%s1509_s2 + $0x2a0] sm:$0xff] }
  0x33   : > { %342 = vmatpush.msrb.mxu0 %v737_v5  ;;  %400 = vmatpush.msrb.mxu1 %v769_v31  ;;  %v757_v4 = vld [vmem:[%s1509_s2 + $0x200] sm:$0xff]  ;;  %v744_v5 = vld [vmem:[%s1509_s2 + $0x198] sm:$0xff]  ;;  %v795_v26 = vld [vmem:[%s1508_s1 + $0x130] sm:$0xff] }
  0x34   : > { %419 = vmatpush.msrb.mxu2 %v754_v29  ;;  %457 = vmatpush.msrb.mxu3 %v786_v30  ;;  %v794_v27 = vld [vmem:[%s1508_s1 + $0x128] sm:$0xff]  ;;  %v793_v28 = vld [vmem:[%s1508_s1 + $0x120] sm:$0xff]  ;;  %v792_v29 = vld [vmem:[%s1508_s1 + $0x118] sm:$0xff] }
  0x35   : > { %343 = vmatpush.msrb.mxu0 %v736_v6  ;;  %401 = vmatpush.msrb.mxu1 %v768_v34  ;;  %v776_v6 = vld [vmem:[%s1509_s2 + $0x298] sm:$0xff]  ;;  %v791_v30 = vld [vmem:[%s1508_s1 + $0x110] sm:$0xff]  ;;  %v790_v31 = vld [vmem:[%s1508_s1 + $0x108] sm:$0xff] }
  0x36   : > { %420 = vmatpush.msrb.mxu2 %v753_v32  ;;  %458 = vmatpush.msrb.mxu3 %v785_v33  ;;  %v789_v32 = vld [vmem:[%s1508_s1 + $0x100] sm:$0xff]  ;;  %v836_v33 = vld [vmem:[%s1509_s2 + $0x3f8] sm:$0xff] }
  0x37   : > { %344 = vmatpush.msrb.mxu0 %v735_v7  ;;  %402 = vmatpush.msrb.mxu1 %v767_v37  ;;  %v743_v7 = vld [vmem:[%s1509_s2 + $0x190] sm:$0xff]  ;;  %v820_v34 = vld [vmem:[%s1509_s2 + $0x378] sm:$0xff] }
  0x38   : > { %421 = vmatpush.msrb.mxu2 %v752_v35  ;;  %459 = vmatpush.msrb.mxu3 %v784_v36  ;;  %v852_v35 = vld [vmem:[%s1509_s2 + $0x478] sm:$0xff]  ;;  %v835_v36 = vld [vmem:[%s1509_s2 + $0x3f0] sm:$0xff] }
  0x39   : > { %345 = vmatpush.msrb.mxu0 %v734_v8  ;;  %403 = vmatpush.msrb.mxu1 %v766_v40  ;;  %v775_v8 = vld [vmem:[%s1509_s2 + $0x290] sm:$0xff]  ;;  %v818_v40 = vld [vmem:[%s1509_s2 + $0x368] sm:$0xff] }
  0x3a   : > { %422 = vmatpush.msrb.mxu2 %v751_v38  ;;  %460 = vmatpush.msrb.mxu3 %v783_v39  ;;  %v819_v37 = vld [vmem:[%s1509_s2 + $0x370] sm:$0xff]  ;;  %v834_v39 = vld [vmem:[%s1509_s2 + $0x3e8] sm:$0xff] }
  0x3b   : > { %346 = vmatpush.msrb.mxu0 %v733_v9  ;;  %404 = vmatpush.msrb.mxu1 %v765_v43  ;;  %v742_v9 = vld [vmem:[%s1509_s2 + $0x188] sm:$0xff]  ;;  %v851_v38 = vld [vmem:[%s1509_s2 + $0x470] sm:$0xff]  ;;  %v817_v43 = vld [vmem:[%s1509_s2 + $0x360] sm:$0xff] }
  0x3c   : > { %423 = vmatpush.msrb.mxu2 %v750_v41  ;;  %461 = vmatpush.msrb.mxu3 %v782_v42  ;;  %v850_v41 = vld [vmem:[%s1509_s2 + $0x468] sm:$0xff]  ;;  %v833_v42 = vld [vmem:[%s1509_s2 + $0x3e0] sm:$0xff] }
  0x3d   : > { %347 = vmatpush.msrb.mxu0 %v732_v10  ;;  %405 = vmatpush.msrb.mxu1 %v764_v47  ;;  %v774_v10 = vld [vmem:[%s1509_s2 + $0x288] sm:$0xff]  ;;  %v816_v47 = vld [vmem:[%s1509_s2 + $0x358] sm:$0xff] }
  0x3e   : > { %424 = vmatpush.msrb.mxu2 %v749_v44  ;;  %462 = vmatpush.msrb.mxu3 %v781_v45  ;;  %v849_v44 = vld [vmem:[%s1509_s2 + $0x460] sm:$0xff]  ;;  %v832_v45 = vld [vmem:[%s1509_s2 + $0x3d8] sm:$0xff] }
  0x3f   : > { %348 = vmatpush.msrb.mxu0 %v731_v15  ;;  %406 = vmatpush.msrb.mxu1 %v763_v50  ;;  %v802_v15 = vld [vmem:[%s1508_s1 + $0x168] sm:$0xff]  ;;  %v815_v50 = vld [vmem:[%s1509_s2 + $0x350] sm:$0xff] }
  0x40   : > { %425 = vmatpush.msrb.mxu2 %v748_v48  ;;  %463 = vmatpush.msrb.mxu3 %v780_v49  ;;  %v848_v48 = vld [vmem:[%s1509_s2 + $0x458] sm:$0xff]  ;;  %v831_v49 = vld [vmem:[%s1509_s2 + $0x3d0] sm:$0xff] }
  0x41   : > { %349 = vmatpush.msrb.mxu0 %v730_v16  ;;  %407 = vmatpush.msrb.mxu1 %v762_v59  ;;  %v801_v16 = vld [vmem:[%s1508_s1 + $0x160] sm:$0xff]  ;;  %v812_v59 = vld [vmem:[%s1509_s2 + $0x338] sm:$0xff] }
  0x42   : > { %426 = vmatpush.msrb.mxu2 %v747_v51  ;;  %464 = vmatpush.msrb.mxu3 %v779_v52  ;;  %v847_v51 = vld [vmem:[%s1509_s2 + $0x450] sm:$0xff]  ;;  %v830_v52 = vld [vmem:[%s1509_s2 + $0x3c8] sm:$0xff] }
  0x43   : > { %350 = vmatpush.msrb.mxu0 %v729_v17  ;;  %408 = vmatpush.msrb.mxu1 %v761_v60  ;;  %v800_v17 = vld [vmem:[%s1508_s1 + $0x158] sm:$0xff] }
  0x44   : > { %427 = vmatpush.msrb.mxu2 %v746_v63  ;;  %465 = vmatpush.msrb.mxu3 %v778_v0  ;;  %v844_v60 = vld [vmem:[%s1509_s2 + $0x438] sm:$0xff]  ;;  %v843_v63 = vld [vmem:[%s1509_s2 + $0x430] sm:$0xff] }
  0x45   : > { %351 = vmatpush.msrb.mxu0 %v728_v18  ;;  %409 = vmatpush.msrb.mxu1 %v760_v61  ;;  %v799_v18 = vld [vmem:[%s1508_s1 + $0x150] sm:$0xff] }
  0x46   : > { %428 = vmatpush.msrb.mxu2 %v745_v2  ;;  %466 = vmatpush.msrb.mxu3 %v777_v3  ;;  %v827_v61 = vld [vmem:[%s1509_s2 + $0x3b0] sm:$0xff] }
  0x47   : > { %352 = vmatpush.msrb.mxu0 %v727_v19  ;;  %410 = vmatpush.msrb.mxu1 %v759_v62  ;;  %v798_v19 = vld [vmem:[%s1508_s1 + $0x148] sm:$0xff]  ;;  %v811_v62 = vld [vmem:[%s1509_s2 + $0x330] sm:$0xff] }
  0x48   : > { %429 = vmatpush.msrb.mxu2 %v744_v5  ;;  %467 = vmatpush.msrb.mxu3 %v776_v6  ;;  %v826_v6 = vld [vmem:[%s1509_s2 + $0x3a8] sm:$0xff] }
  0x49   : > { %353 = vmatpush.msrb.mxu0 %v726_v20  ;;  %411 = vmatpush.msrb.mxu1 %v758_v1  ;;  %v797_v20 = vld [vmem:[%s1508_s1 + $0x140] sm:$0xff] }
  0x4a   : > { %430 = vmatpush.msrb.mxu2 %v743_v7  ;;  %468 = vmatpush.msrb.mxu3 %v775_v8  ;;  %v825_v7 = vld [vmem:[%s1509_s2 + $0x3a0] sm:$0xff]  ;;  %v824_v8 = vld [vmem:[%s1509_s2 + $0x398] sm:$0xff] }
  0x4b   : > { %354 = vmatpush.msrb.mxu0 %v725_v21  ;;  %412 = vmatpush.msrb.mxu1 %v757_v4  ;;  %v796_v21 = vld [vmem:[%s1508_s1 + $0x138] sm:$0xff] }
  0x4c   : > { %431 = vmatpush.msrb.mxu2 %v742_v9  ;;  %469 = vmatpush.msrb.mxu3 %v774_v10  ;;  %v823_v9 = vld [vmem:[%s1509_s2 + $0x390] sm:$0xff]  ;;  %v810_v10 = vld [vmem:[%s1509_s2 + $0x328] sm:$0xff] }
  0xa8   : > { %v202_v11 = vpop.f32.mrf.mxu0 }
  0xa9   : > { %v205_v12 = vmax.f32 %v202_v11, 0.0  ;;  %v741_v11 = vld [vmem:[%s1509_s2 + $0x180] sm:$0xff] }
  0xaa   : > { %432 = vmatpush.msrb.mxu2 %v741_v11  ;;  %v842_v11 = vld [vmem:[%s1509_s2 + $0x428] sm:$0xff] }
  0xab   : > { %206 = vst [vmem:[#allocation2 + $0x1] sm:$0xff] %v205_v12  ;;  %258 = vmatmul.f32.vlgmr.msra.gmra.mxu1 %v205_v12  ;;  %v773_v12 = vld [vmem:[%s1509_s2 + $0x280] sm:$0xff] }
  0xac   : > { %470 = vmatpush.msrb.mxu3 %v773_v12  ;;  %552 = vmatpush.msra.mxu1 %v836_v33  ;;  %v822_v12 = vld [vmem:[%s1509_s2 + $0x388] sm:$0xff] }
  0xae   : > { %553 = vmatpush.msra.mxu1 %v835_v36 }
  0xb0   : > { %554 = vmatpush.msra.mxu1 %v834_v39 }
  0xb2   : > { %v207_v13 = vld [vmem:[#allocation2] sm:$0xff]  ;;  %555 = vmatpush.msra.mxu1 %v833_v42 }
  0xb3   : > { %v282_v14 = vld [vmem:[#allocation2 + $0x2] sm:$0xff]  ;;  %278 = vmatmul.f32.vlgmr.msra.gmra.mxu2 %v207_v13  ;;  %v804_v13 = vld [vmem:[%s1508_s1 + $0x178] sm:$0xff] }
  0xb4   : > { %316 = vmatmul.f32.vlgmr.msra.gmra.mxu3 %v282_v14  ;;  %v803_v14 = vld [vmem:[%s1508_s1 + $0x170] sm:$0xff]  ;;  %494 = vmatpush.msra.mxu0 %v804_v13  ;;  %v809_v13 = vld [vmem:[%s1509_s2 + $0x320] sm:$0xff] }
  0xb5   : > { %572 = vmatpush.msra.mxu2 %v820_v34  ;;  %610 = vmatpush.msra.mxu3 %v852_v35 }
  0xb6   : > { %495 = vmatpush.msra.mxu0 %v803_v14  ;;  %556 = vmatpush.msra.mxu1 %v832_v45  ;;  %v841_v14 = vld [vmem:[%s1509_s2 + $0x420] sm:$0xff] }
  0xb7   : > { %573 = vmatpush.msra.mxu2 %v819_v37  ;;  %611 = vmatpush.msra.mxu3 %v851_v38 }
  0xb8   : > { %496 = vmatpush.msra.mxu0 %v802_v15  ;;  %557 = vmatpush.msra.mxu1 %v831_v49  ;;  %v821_v15 = vld [vmem:[%s1509_s2 + $0x380] sm:$0xff] }
  0xb9   : > { %574 = vmatpush.msra.mxu2 %v818_v40  ;;  %612 = vmatpush.msra.mxu3 %v850_v41 }
  0xba   : > { %497 = vmatpush.msra.mxu0 %v801_v16  ;;  %558 = vmatpush.msra.mxu1 %v830_v52  ;;  %v808_v16 = vld [vmem:[%s1509_s2 + $0x318] sm:$0xff] }
  0xbb   : > { %575 = vmatpush.msra.mxu2 %v817_v43  ;;  %613 = vmatpush.msra.mxu3 %v849_v44 }
  0xbc   : > { %498 = vmatpush.msra.mxu0 %v800_v17  ;;  %v840_v17 = vld [vmem:[%s1509_s2 + $0x418] sm:$0xff] }
  0xbd   : > { %576 = vmatpush.msra.mxu2 %v816_v47  ;;  %614 = vmatpush.msra.mxu3 %v848_v48 }
  0xbe   : > { %499 = vmatpush.msra.mxu0 %v799_v18  ;;  %v807_v18 = vld [vmem:[%s1509_s2 + $0x310] sm:$0xff] }
  0xbf   : > { %577 = vmatpush.msra.mxu2 %v815_v50  ;;  %615 = vmatpush.msra.mxu3 %v847_v51 }
  0xc0   : > { %500 = vmatpush.msra.mxu0 %v798_v19  ;;  %v839_v19 = vld [vmem:[%s1509_s2 + $0x410] sm:$0xff] }
  0xc2   : > { %501 = vmatpush.msra.mxu0 %v797_v20  ;;  %v806_v20 = vld [vmem:[%s1509_s2 + $0x308] sm:$0xff] }
  0xc4   : > { %502 = vmatpush.msra.mxu0 %v796_v21  ;;  %v838_v21 = vld [vmem:[%s1509_s2 + $0x408] sm:$0xff] }
  0xc6   : > { %503 = vmatpush.msra.mxu0 %v795_v26 }
  0xc8   : > { %504 = vmatpush.msra.mxu0 %v794_v27 }
  0xca   : > { %505 = vmatpush.msra.mxu0 %v793_v28 }
  0xcc   : > { %506 = vmatpush.msra.mxu0 %v792_v29 }
  0xce   : > { %507 = vmatpush.msra.mxu0 %v791_v30 }
  0xd0   : > { %508 = vmatpush.msra.mxu0 %v790_v31 }
  0xd2   : > { %509 = vmatpush.msra.mxu0 %v789_v32 }
 0x128   : > { %v259_v53 = vpop.f32.mrf.mxu1 }
 0x136   : > { %v279_v54 = vpop.f32.mrf.mxu2 }
 0x137   : > { %v280_v55 = vadd.f32 %v279_v54, %v259_v53  ;;  %v317_v56 = vpop.f32.mrf.mxu3  ;;  %v814_v53 = vld [vmem:[%s1509_s2 + $0x348] sm:$0xff] }
 0x138   : > { %v846_v54 = vld [vmem:[%s1509_s2 + $0x448] sm:$0xff]  ;;  %578 = vmatpush.msra.mxu2 %v814_v53 }
 0x139   : > { %v320_v57 = vadd.f32 %v317_v56, %v280_v55  ;;  %v829_v55 = vld [vmem:[%s1509_s2 + $0x3c0] sm:$0xff]  ;;  %616 = vmatpush.msra.mxu3 %v846_v54 }
 0x13a   : > { %v813_v56 = vld [vmem:[%s1509_s2 + $0x340] sm:$0xff]  ;;  %559 = vmatpush.msra.mxu1 %v829_v55 }
 0x13b   : > { %v321_v58 = vmax.f32 %v320_v57, 0.0  ;;  %v845_v57 = vld [vmem:[%s1509_s2 + $0x440] sm:$0xff]  ;;  %579 = vmatpush.msra.mxu2 %v813_v56 }
 0x13c   : > { %617 = vmatpush.msra.mxu3 %v845_v57 }
 0x13d   : > { %355 = vmatmul.f32.vlgmr.msrb.gmra.mxu0 %v321_v58  ;;  %v828_v58 = vld [vmem:[%s1509_s2 + $0x3b8] sm:$0xff]  ;;  %580 = vmatpush.msra.mxu2 %v812_v59 }
 0x13e   : > { %560 = vmatpush.msra.mxu1 %v828_v58  ;;  %618 = vmatpush.msra.mxu3 %v844_v60 }
 0x13f   : > { %581 = vmatpush.msra.mxu2 %v811_v62 }
 0x140   : > { %561 = vmatpush.msra.mxu1 %v827_v61  ;;  %619 = vmatpush.msra.mxu3 %v843_v63 }
 0x141   : > { %582 = vmatpush.msra.mxu2 %v810_v10 }
 0x142   : > { %562 = vmatpush.msra.mxu1 %v826_v6  ;;  %620 = vmatpush.msra.mxu3 %v842_v11 }
 0x143   : > { %583 = vmatpush.msra.mxu2 %v809_v13 }
 0x144   : > { %563 = vmatpush.msra.mxu1 %v825_v7  ;;  %621 = vmatpush.msra.mxu3 %v841_v14 }
 0x145   : > { %584 = vmatpush.msra.mxu2 %v808_v16 }
 0x146   : > { %564 = vmatpush.msra.mxu1 %v824_v8  ;;  %622 = vmatpush.msra.mxu3 %v840_v17 }
 0x147   : > { %585 = vmatpush.msra.mxu2 %v807_v18 }
 0x148   : > { %565 = vmatpush.msra.mxu1 %v823_v9  ;;  %623 = vmatpush.msra.mxu3 %v839_v19 }
 0x149   : > { %586 = vmatpush.msra.mxu2 %v806_v20 }
 0x14a   : > { %566 = vmatpush.msra.mxu1 %v822_v12  ;;  %624 = vmatpush.msra.mxu3 %v838_v21 }
 0x14c   : > { %567 = vmatpush.msra.mxu1 %v821_v15 }
 0x1ba   : > { %v356_v22 = vpop.f32.mrf.mxu0 }
 0x1bb   : > { %v359_v23 = vmax.f32 %v356_v22, 0.0  ;;  %v805_v22 = vld [vmem:[%s1509_s2 + $0x300] sm:$0xff] }
 0x1bc   : > { %587 = vmatpush.msra.mxu2 %v805_v22 }
 0x1bd   : > { %360 = vst [vmem:[#allocation2 + $0x1] sm:$0xff] %v359_v23  ;;  %413 = vmatmul.f32.vlgmr.msrb.gmra.mxu1 %v359_v23  ;;  %v837_v23 = vld [vmem:[%s1509_s2 + $0x400] sm:$0xff] }
 0x1be   : > { %625 = vmatpush.msra.mxu3 %v837_v23 }
 0x1c4   : > { %v361_v24 = vld [vmem:[#allocation2] sm:$0xff] }
 0x1c5   : > { %v437_v25 = vld [vmem:[#allocation2 + $0x2] sm:$0xff]  ;;  %433 = vmatmul.f32.vlgmr.msrb.gmra.mxu2 %v361_v24 }
 0x1c6   : > { %471 = vmatmul.f32.vlgmr.msrb.gmra.mxu3 %v437_v25 }
 0x23a   : > { %v414_v0 = vpop.f32.mrf.mxu1 }
 0x248   : > { %v434_v1 = vpop.f32.mrf.mxu2 }
 0x249   : > { %v435_v2 = vadd.f32 %v434_v1, %v414_v0  ;;  %v472_v3 = vpop.f32.mrf.mxu3 }
 0x24b   : > { %v475_v4 = vadd.f32 %v472_v3, %v435_v2 }
 0x24d   : > { %v476_v5 = vmax.f32 %v475_v4, 0.0 }
 0x24f   : > { %510 = vmatmul.f32.vlgmr.msra.gmra.mxu0 %v476_v5 }
 0x2cc   : > { %v511_v24 = vpop.f32.mrf.mxu0 }
 0x2cd   : > { %v514_v25 = vmax.f32 %v511_v24, 0.0 }
 0x2cf   : > { %515 = vst [vmem:[#allocation2 + $0x1] sm:$0xff] %v514_v25  ;;  %568 = vmatmul.f32.vlgmr.msra.gmra.mxu1 %v514_v25 }
 0x2d6   : > { %v516_v26 = vld [vmem:[#allocation2] sm:$0xff] }
 0x2d7   : > { %v592_v27 = vld [vmem:[#allocation2 + $0x2] sm:$0xff]  ;;  %588 = vmatmul.f32.vlgmr.msra.gmra.mxu2 %v516_v26 }
 0x2d8   : > { %626 = vmatmul.f32.vlgmr.msra.gmra.mxu3 %v592_v27 }
 0x34c   : > { %v569_v28 = vpop.f32.mrf.mxu1 }
 0x35a   : > { %v589_v29 = vpop.f32.mrf.mxu2 }
 0x35b   : > { %v590_v30 = vadd.f32 %v589_v29, %v569_v28  ;;  %v627_v31 = vpop.f32.mrf.mxu3 }
 0x35d   : > { %v630_v32 = vadd.f32 %v627_v31, %v590_v30 }
 0x35f   : > { %v631_v33 = vadd.f32 %v630_v32, %v1057_v46 }
 0x361   : > { %632 = vst [vmem:[%s165_s17] sm:$0xff] %v631_v33 }
 0x362 PF: > { %s13_s12 = sadd.s32 1, %s870_s12  }
 0x363   : > { %p10_p4 = scmp.ge.s32.totalorder %s13_s12, 4  }
 0x365   :  { %12 = sbr.rel (!%p10_p4) target bundleno = 1 (0x1), region = 72 }

</bundles_post_ra>
